<compile_context>
chip_gen: v5e
topology: v5e:2x2
jax: 0.10.0
libtpu: 0.0.40
codegen_flags: <defaults>
</compile_context>

<pallas_src>
import math
import jax
import jax.numpy as jnp
from jax.experimental import pallas as pl
from jax.experimental.pallas import tpu as pltpu


# ----------------------------- PE construction ------------------------------

def _create_pe(max_len: int, d_model: int) -> jnp.ndarray:
    """Deterministic sinusoidal PE, identical math to the PyTorch helper.

    Returns shape (1, max_len, d_model), float32.
    """
    position = jnp.arange(0, max_len, dtype=jnp.float32)[:, None]            # (L, 1)
    div_term = jnp.exp(
        jnp.arange(0, d_model, 2, dtype=jnp.float32) * (-math.log(10000.0) / d_model)
    )                                                                        # (ceil(D/2),)
    angles = position * div_term                                             # (L, ceil(D/2))
    pe = jnp.zeros((max_len, d_model), dtype=jnp.float32)
    pe = pe.at[:, 0::2].set(jnp.sin(angles))
    pe = pe.at[:, 1::2].set(jnp.cos(angles)[:, : d_model // 2])
    return pe[None, :, :]                                                    # (1, L, D)


# ----------------------------- Kernel & tiling -------------------------------

_VMEM_LIMIT_BYTES = 48 * 1024 * 1024       # explicit scoped-VMEM limit (< v7x 64 MiB physical)
_PIPELINE_BUDGET_BYTES = 36 * 1024 * 1024  # headroom for the 6 double-buffered tiles
_PER_BUFFER_TARGET_BYTES = 4 * 1024 * 1024 # per-buffer tile target (amortizes 0.35 us/step)


def _add_pe_kernel(x_ref, pe_ref, o_ref):
    # x_ref / pe_ref / o_ref: (1, TS, row_len), all in x's dtype (pe pre-cast).
    # Pure HBM-bound load-add-store.
    o_ref[...] = x_ref[...] + pe_ref[...]


def _choose_fold(seq_len: int, d_model: int) -> int:
    """Smallest f dividing seq_len with (f * d_model) % 128 == 0, else 1.

    Folding f sequence rows into the lane axis makes the last block dim a
    multiple of 128 (unmasked full-lane stores). Falls back to f=1 (lane dim
    = d_model, may be masked but still correct) if no such fold exists.
    """
    if d_model % 128 == 0:
        return 1
    for f in range(1, seq_len + 1):
        if seq_len % f == 0 and (f * d_model) % 128 == 0:
            return f
    return 1


def _sublane_multiple(*dtypes) -> int:
    """Native sublane tile height: 8 for f32, 16 for bf16, 32 for int8/fp8."""
    m = 8
    for dt in dtypes:
        m = max(m, 32 // max(1, jnp.dtype(dt).itemsize))
    return m


def _choose_tile_rows(batch: int, n_rows: int, row_len: int,
                      x_dtype, pe_dtype) -> int:
    """Rows per tile, accounting for all six double-buffered tiles."""
    x_isz = jnp.dtype(x_dtype).itemsize
    pe_isz = jnp.dtype(pe_dtype).itemsize
    sub = _sublane_multiple(x_dtype, pe_dtype)

    # Full pipeline footprint per tile row: 2*x + 2*pe + 2*out (out = x dtype).
    bytes_per_row_pipeline = row_len * (4 * x_isz + 2 * pe_isz)
    rows_by_budget = _PIPELINE_BUDGET_BYTES // max(1, bytes_per_row_pipeline)
    rows_by_target = _PER_BUFFER_TARGET_BYTES // max(1, row_len * max(x_isz, pe_isz))
    rows = max(1, min(rows_by_budget, rows_by_target))

    # v7x has 2 TensorCores: if batch == 1, keep >= 2 blocks on the row axis
    # so both cores get work.  (Harmless on single-TC v5e/v6e.)
    if batch == 1 and n_rows >= 2 * sub:
        rows = min(rows, -(-n_rows // 2))      # ceil(n_rows / 2)

    if rows >= n_rows:
        return n_rows                          # full extent (always legal)

    rows = max(sub, (rows // sub) * sub)       # native sublane multiple
    if rows >= n_rows:
        return n_rows

    # Prefer a tile height that divides n_rows (no ragged masked last tile).
    for cand in range(rows, sub - 1, -sub):
        if n_rows % cand == 0:
            return cand
    return rows


def _add_pe_pallas(x_v: jnp.ndarray, pe_v: jnp.ndarray, *, donate_x: bool = False):
    """x_v, pe_v: lane-dense views (B, n_rows, row_len) / (1, n_rows, row_len)."""
    B, n_rows, row_len = x_v.shape
    ts = _choose_tile_rows(B, n_rows, row_len, x_v.dtype, pe_v.dtype)
    grid = (pl.cdiv(n_rows, ts), B)            # row-tiles outer, batch inner
                                               # -> pe block constant over inner
                                               #    loop (Pallas skips re-fetch)

    extra = {"input_output_aliases": {0: 0}} if donate_x else {}
    return pl.pallas_call(
        _add_pe_kernel,
        out_shape=jax.ShapeDtypeStruct((B, n_rows, row_len), x_v.dtype),
        grid_spec=pltpu.PrefetchScalarGridSpec(
            num_scalar_prefetch=0,
            grid=grid,
            in_specs=[
                pl.BlockSpec((1, ts, row_len), lambda t, b: (b, t, 0)),  # x tile
                pl.BlockSpec((1, ts, row_len), lambda t, b: (0, t, 0)),  # pe tile
            ],
            out_specs=pl.BlockSpec((1, ts, row_len), lambda t, b: (b, t, 0)),
        ),
        compiler_params=pltpu.CompilerParams(
            dimension_semantics=("parallel", "parallel"),
            vmem_limit_bytes=_VMEM_LIMIT_BYTES,
        ),
        **extra,
    )(x_v, pe_v)


# ----------------------------- Module wrapper --------------------------------

class PositionalEncoding:
    """Mirrors the PyTorch module: holds the pe buffer, mutates it when
    seq_len > max_len, and caches the pre-cast / pre-folded pe per
    (seq_len, dtype) so the per-call path is a single Pallas add."""

    def __init__(self, d_model: int, max_len: int = 10):
        self.d_model = d_model
        self.max_len = max_len
        self.pe = _create_pe(max_len, d_model)      # (1, max_len, d_model) f32
        self._folded_cache = {}                     # (seq_len, dtype) -> (pe_v, fold)

    def _folded_pe(self, seq_len: int, dtype):
        key = (seq_len, jnp.dtype(dtype).name)
        hit = self._folded_cache.get(key)
        if hit is not None:
            return hit
        fold = _choose_fold(seq_len, self.d_model)
        n_rows = seq_len // fold
        pe_v = (
            self.pe[:, :seq_len, :]
            .astype(dtype)                          # cast once, not per call / in kernel
            .reshape(1, n_rows, fold * self.d_model)
        )
        pe_v = jax.block_until_ready(pe_v)
        self._folded_cache[key] = (pe_v, fold)
        return pe_v, fold

    def __call__(self, x: jnp.ndarray, *, donate_x: bool = False) -> jnp.ndarray:
        B, seq_len, D = x.shape
        assert D == self.d_model

        if seq_len > self.max_len:
            # NB: the PyTorch reference restarts positions at 0 for the appended
            # chunk; reproduced exactly (likely a bug in the reference, kept on
            # purpose).
            additional_pe = _create_pe(seq_len - self.max_len, self.d_model)
            self.pe = jnp.concatenate([self.pe, additional_pe.astype(self.pe.dtype)], axis=1)
            self.max_len = seq_len
            self._folded_cache.clear()

        pe_v, fold = self._folded_pe(seq_len, x.dtype)
        n_rows = seq_len // fold
        row_len = fold * self.d_model

        x_v = x.reshape(B, n_rows, row_len)
        out = _add_pe_pallas(x_v, pe_v, donate_x=donate_x)
        return out.reshape(B, seq_len, self.d_model)


# ----------------------------------- Demo ------------------------------------

if __name__ == "__main__":
    d_model = 32
    max_len = 10
    batch, seq = 2, 8

    module = PositionalEncoding(d_model, max_len)
    pe_initial = module.pe

    key = jax.random.PRNGKey(0)
    x = jax.random.normal(key, (batch, seq, d_model), dtype=jnp.float32)

    out = module(x)
    out = jax.block_until_ready(out)

    # Reference check in plain JAX.
    ref = x + pe_initial[:, :seq, :].astype(x.dtype)
    assert out.shape == (batch, seq, d_model)
    assert module.max_len == max_len
    assert jnp.allclose(out, ref, atol=1e-6), "mismatch vs reference (seq <= max_len)"

    # Second call: seq_len > max_len exercises the pe-extension path
    # (positions restart at 0 for the appended chunk, exactly like PyTorch).
    seq2 = 12
    x2 = jax.random.normal(jax.random.PRNGKey(1), (batch, seq2, d_model), dtype=jnp.float32)
    out2 = jax.block_until_ready(module(x2))
    pe_ext = jnp.concatenate(
        [pe_initial, _create_pe(seq2 - max_len, d_model)], axis=1
    )
    ref2 = x2 + pe_ext[:, :seq2, :].astype(x2.dtype)
    assert module.max_len == seq2
    assert jnp.allclose(out2, ref2, atol=1e-6), "mismatch vs reference (seq > max_len)"

    print("KERNEL_OK")
</pallas_src>

<mosaic_0001>
module attributes {stable_mosaic.version = 11 : i64} {
  func.func @_add_pe_kernel(%arg0: i32, %arg1: i32, %arg2: memref<1x2x128xf32, #tpu.memory_space<vmem>>, %arg3: memref<1x2x128xf32, #tpu.memory_space<vmem>>, %arg4: memref<1x2x128xf32, #tpu.memory_space<vmem>>) attributes {dimension_semantics = [#tpu.dimension_semantics<parallel>, #tpu.dimension_semantics<parallel>], iteration_bounds = array<i64: 1, 2>, scalar_prefetch = 0 : i64, scratch_operands = 0 : i64, tpu.core_type = #tpu.core_type<tc>, window_params = [{transform_indices = @transform_0, window_bounds = array<i64: 1, 2, 128>}, {transform_indices = @transform_1, window_bounds = array<i64: 1, 2, 128>}, {transform_indices = @transform_2, window_bounds = array<i64: 1, 2, 128>}]} {
    %c0 = arith.constant 0 : index
    %c0_0 = arith.constant 0 : index
    %c0_1 = arith.constant 0 : index
    %0 = vector.load %arg2[%c0, %c0_0, %c0_1] : memref<1x2x128xf32, #tpu.memory_space<vmem>>, vector<1x2x128xf32>
    %c0_2 = arith.constant 0 : index
    %c0_3 = arith.constant 0 : index
    %c0_4 = arith.constant 0 : index
    %1 = vector.load %arg3[%c0_2, %c0_3, %c0_4] : memref<1x2x128xf32, #tpu.memory_space<vmem>>, vector<1x2x128xf32>
    %2 = arith.addf %0, %1 : vector<1x2x128xf32>
    %c0_5 = arith.constant 0 : index
    %c0_6 = arith.constant 0 : index
    %c0_7 = arith.constant 0 : index
    %3 = vector.load %arg4[%c0_5, %c0_6, %c0_7] : memref<1x2x128xf32, #tpu.memory_space<vmem>>, vector<1x2x128xf32>
    tpu.vector_store %arg4[%c0_5, %c0_6, %c0_7], %2 {strides = array<i32>} : memref<1x2x128xf32, #tpu.memory_space<vmem>>, vector<1x2x128xf32>,
    return
  }
  func.func @transform_0(%arg0: i32, %arg1: i32) -> (i32, i32, i32) {
    %c0_i32 = arith.constant 0 : i32
    %c0_i32_0 = arith.constant 0 : i32
    return %arg1, %arg0, %c0_i32 : i32, i32, i32
  }
  func.func @transform_1(%arg0: i32, %arg1: i32) -> (i32, i32, i32) {
    %c0_i32 = arith.constant 0 : i32
    %c0_i32_0 = arith.constant 0 : i32
    %c0_i32_1 = arith.constant 0 : i32
    return %c0_i32, %arg0, %c0_i32_0 : i32, i32, i32
  }
  func.func @transform_2(%arg0: i32, %arg1: i32) -> (i32, i32, i32) {
    %c0_i32 = arith.constant 0 : i32
    %c0_i32_0 = arith.constant 0 : i32
    return %arg1, %arg0, %c0_i32 : i32, i32, i32
  }
}

</mosaic_0001>

<bundles_post_ra>
// kernel: tpu_custom_call.1
= control target key start
LH: loop header
LB: loop body
LE: loop exit
PB: predicated region body
PF: predicated region fallthrough
CT: control target
= control target key end

     0   :  { %7 = vsyncpa [#allocation3], 0  ;;  %s714_s0 = inlined_call_operand.hbm [shape: f32[2,2,128], index: 0, kind: input, shape index: {}]   ;;  %s715_s1 = inlined_call_operand.hbm [shape: f32[1,2,128], index: 1, kind: input, shape index: {}]   ;;  %s716_s2 = inlined_call_operand.hbm [shape: f32[2,2,128], index: 2, kind: output, shape index: {}]  }
   0x1   :  { %9 = vsyncpa [#allocation3 + $0x1], 0 }
   0x2   :  { %10 = vsyncpa [#allocation6], 0 }
   0x3   :  { %11 = vsyncpa [#allocation4], 0 }
   0x4   :  { %13 = vsyncpa [#allocation4 + $0x1], 0  ;;  %s565_s9 = smov 0   ;;  %s567_s10 = smov 0  }
   0x5   :  { %s569_s11 = smov 0   ;;  %s571_s12 = smov 0  }
   0x6   :  { %s573_s13 = smov 0   ;;  %s575_s14 = smov 0  }
   0x7 LB: > { %s313_s15 = sadd.s32 4294967295, %s547_s14   ;;  %s314_s16 = sadd.s32 4294967294, %s547_s14   ;;  %s547_s14 = sphi %s575_s14, %s19_s14   ;;  %s543_s13 = sphi %s573_s13, %s728_s13   ;;  %s539_s12 = sphi %s571_s12, %s727_s12   ;;  %s535_s11 = sphi %s569_s11, %s726_s11   ;;  %s531_s10 = sphi %s567_s10, %s725_s10   ;;  %s527_s9 = sphi %s565_s9, %s724_s9  }
   0x8   : > { %p53_p0 = scmp.ne.s32.totalorder %s531_s10, %s527_s9  ;;  %p599_p1 = scmp.eq.s32.totalorder %s313_s15, 0 }
   0x9   : > { %p603_p2 = scmp.eq.s32.totalorder %s313_s15, 1  ;;  %p111_p3 = scmp.eq.s32.totalorder %s314_s16, 1 }
   0xa   : > { %p609_p4 = por %p599_p1, %p53_p0  ;;  %p315_p5 = scmp.ge.s32.totalorder %s547_s14, 1 }
   0xb   : > { %p614_p6 = por %p111_p3, %p53_p0  ;;  %p118_p7 = scmp.lt.s32.totalorder %s547_s14, 3 }
   0xc   : > { %s132_s23 = sshll.u32 %s715_s1, 4  ;;  %p317_p9 = scmp.ge.s32.totalorder %s547_s14, 2  ;;  %s133_s23 = int_to_ptr.hbm [resolvable:$true] %s132_s23 }
   0xd   : > { %p622_p8 = pnand %p315_p5, %p118_p7  ;;  %s549_s25 = smov [#allocation5]  }
   0xe   : > { %s134_s26 = sshll.u32 %s549_s25, 4  ;;  %s28_s27 = sadd.s32 1, %s543_s13  ;;  %s135_s26 = int_to_ptr.vmem [resolvable:$true] %s134_s26 }
   0xf   : > { %p336_p10 = pneg %p622_p8  ;;  %p29_p12 = scmp.ge.s32.totalorder %s28_s27, 2 }
  0x10   : > { %s40_s28 = sadd.s32 1, %s535_s11  ;;  %p47_p13 = scmp.ne.s32.totalorder %s535_s11, %s531_s10 }
  0x11   : > { %p337_p11 = pnand %p336_p10, %p599_p1  ;;  %p48_p0 = scmp.eq.s32.totalorder %s547_s14, 0 }
  0x12   : > { %s730_s27 = smov (%p29_p12, %s28_s27), 0  ;;  %p644_p5 = por %p603_p2, %p47_p13 }
  0x13   : > { %339 = dma.hbm_to_vmem [thread:$0]  (!%p337_p11), %s133_s23, 32, %s135_s26, [#allocation6]  }
  0x14   : > { %p638_p3 = por %p48_p0, %p47_p13  ;;  %s35_s3 = ssub.s32 %s543_s13, %s730_s27 }
  0x15   : > { %p349_p7 = scmp.lt.s32.totalorder %s547_s14, 2  ;;  %p38_p10 = scmp.eq.s32.totalorder %s35_s3, 0 }
  0x16   : > { %s145_s4 = sand.u32 1, %s535_s11   ;;  %s319_s7 = sshll.u32 %s543_s13, 1 }
  0x17   : > { %s318_s5 = sshll.u32 %s145_s4, 1  ;;  %s154_s16 = scalar_lea.hbm %s714_s0, %s319_s7 }
  0x18   : > { %s653_s6 = scalar_select %p38_p10, %s535_s11, %s40_s28  }
  0x19   : > { %s149_s21 = scalar_lea.vmem [#allocation2], %s318_s5  ;;  %s156_s18 = sshll.u32 %s154_s16, 4  ;;  %s157_s18 = int_to_ptr.hbm [resolvable:$true] %s156_s18 }
  0x1a   : > { %s158_s22 = sshll.u32 %s149_s21, 4  ;;  %p341_p2 = pnand %p349_p7, %p638_p3  ;;  %s159_s22 = int_to_ptr.vmem [resolvable:$true] %s158_s22 }
  0x1b   : > { %s146_s23 = scalar_lea.sflag [#allocation3], %s145_s4  ;;  %167 = sbr.rel (%p622_p8) target bundleno = 50 (0x32), region = 28 }
  0x1c   : > { %343 = dma.hbm_to_vmem [thread:$0]  (!%p341_p2), %s157_s18, 32, %s159_s22, %s146_s23  }
  0x1d   : > { %s664_s25 = sand.u32 (!%p622_p8), 1, %s531_s10  }
  0x1e   : > { %s321_s26 = sshll.u32 (!%p622_p8), %s664_s25, 1  ;;  %s170_s28 = scalar_lea.sflag (!%p622_p8), [#allocation3], %s664_s25 }
  0x1f   : > { %s173_s3 = scalar_lea.vmem (!%p622_p8), [#allocation2], %s321_s26 }
  0x20   : > { %514 = dma.done.wait (%p609_p4), %s170_s28, 32  }
  0x21   : > { %516 = vsyncadd (%p609_p4), %s170_s28, 4294967264 }
  0x22   : > { %518 = dma.done.wait (%p599_p1), [#allocation6], 32  }
  0x23   : > { %520 = vsyncadd (%p599_p1), [#allocation6], 4294967264  ;;  %s325_s24 = sshll.u32 %s539_s12, 1  ;;  %s199_s7 = scalar_lea.vmem [#allocation7], %s321_s26  ;;  %v200_v0 = vld [vmem:[%s173_s3] sm:$0x3] }
  0x24   : > { %s216_s5 = scalar_lea.hbm %s716_s2, %s325_s24  ;;  %s218_s8 = sshll.u32 %s199_s7, 4  ;;  %v201_v1 = vld [vmem:[#allocation5] sm:$0x3]  ;;  %s219_s8 = int_to_ptr.vmem [resolvable:$true] %s218_s8 }
  0x25   : > { %s220_s15 = sshll.u32 %s216_s5, 4  ;;  %v202_v2 = vadd.f32 %v201_v1, %v200_v0  ;;  %s205_s19 = scalar_lea.sflag [#allocation4], %s664_s25  ;;  %s221_s15 = int_to_ptr.hbm [resolvable:$true] %s220_s15 }
  0x26   : > { %s475_s17 = sshra.s32 %s221_s15, 4  ;;  %s481_s22 = scalar_lea.hbm %s716_s2, 4  ;;  %s476_s17 = int_to_ptr.hbm [resolvable:$true] %s475_s17 }
  0x27   : > { %203 = vst [vmem:[%s199_s7] sm:$0x3] %v202_v2  ;;  %s477_s16 = scalar_lea.hbm %s476_s17, 2  ;;  %p482_p11 = scmp.lt.s32.totalorder %s476_s17, %s716_s2 }
  0x28   : > { %p478_p1 = scmp.ne.s32.totalorder %s476_s17, %s477_s16  ;;  %p483_p12 = scmp.lt.s32.totalorder %s481_s22, %s477_s16 }
  0x2a   : > { %p479_p4 = pnand %p478_p1, %p644_p5  ;;  %p484_p13 = por %p483_p12, %p482_p11 }
  0x2c   : > { %p480_p8 = pneg %p479_p4 }
  0x2e   : > { %p485_p0 = pnand %p484_p13, %p480_p8 }
  0x30   : > { %488 = shalt.err (!%p485_p0)
}
  0x31   : > { %334 = dma.vmem_to_hbm [thread:$0]  (%p644_p5), %s219_s8, 32, %s221_s15, %s205_s19  }
  0x32 PF: > { %s232_s25 = sand.u32 1, %s527_s9   ;;  %p345_p3 = pnand %p317_p9, %p614_p6 }
  0x33   : > { %s233_s26 = scalar_lea.sflag [#allocation4], %s232_s25 }
  0x34   : > { %p346_p7 = pneg %p345_p3 }
  0x36   : > { %522 = dma.done.wait (%p346_p7), %s233_s26, 32  }
  0x37   : > { %524 = vsyncadd (%p346_p7), %s233_s26, 4294967264  ;;  %s19_s14 = sadd.s32 1, %s547_s14   ;;  %s724_s9 = smov %s531_s10 }
  0x38   : > { %p16_p10 = scmp.ge.s32.totalorder %s19_s14, 4   ;;  %s725_s10 = smov %s535_s11 }
  0x39   : > { %s726_s11 = smov %s653_s6  ;;  %s727_s12 = smov %s543_s13 }
  0x3a   : > { %s728_s13 = smov %s730_s27  ;;  %18 = sbr.rel (!%p16_p10) target bundleno = 7 (0x7), region = 78 }
  0x3f   :  { %239 = vsyncpa [#allocation3], 1 }
  0x40   :  { %241 = vsyncpa [#allocation3 + $0x1], 1 }
  0x41   :  { %242 = vsyncpa [#allocation6], 1 }
  0x42   :  { %243 = vsyncpa [#allocation4], 1 }
  0x43   :  { %245 = vsyncpa [#allocation4 + $0x1], 1 }

</bundles_post_ra>
